<compile_context>
chip_gen: v7x
topology: tpu7x:2x2x1
jax: 0.10.0
libtpu: 0.0.40
codegen_flags: <defaults>
</compile_context>

<pallas_src>
import functools

import jax
import jax.numpy as jnp
from jax import lax
from jax.experimental import pallas as pl
from jax.experimental.pallas import tpu as pltpu

LANES = 128
TM_MAX = 4096  # max rows per grid step -> (4096, 128) f32 block = 2 MiB


def _round_up(v: int, m: int) -> int:
    return ((v + m - 1) // m) * m


def _dice_partials_kernel(x_ref, t_ref, o_ref, *, tm: int, steps_per_core: int,
                          rows_valid: int, needs_mask: bool):
    c = pl.program_id(0)   # core-split axis ("parallel")
    i = pl.program_id(1)   # reduction axis ("arbitrary")

    @pl.when(i == 0)
    def _():
        o_ref[...] = jnp.zeros_like(o_ref)

    x = x_ref[...].astype(jnp.float32)
    t = t_ref[...].astype(jnp.float32)

    if needs_mask:
        # Mask rows past the true row count (partial tail block and any
        # clamped/duplicate overhang block from the core split).
        row0 = (c * steps_per_core + i) * tm
        rid = lax.broadcasted_iota(jnp.int32, (tm, LANES), 0) + row0
        valid = rid < rows_valid
        x = jnp.where(valid, x, 0.0)
        t = jnp.where(valid, t, 0.0)

    # Vector partial sums kept lane-dense; cheap VPU work hidden under DMA.
    o_ref[0, 0] += jnp.sum(x * t, axis=0, keepdims=True)  # intersection
    o_ref[0, 1] += jnp.sum(x, axis=0, keepdims=True)       # sum(inputs)
    o_ref[0, 2] += jnp.sum(t, axis=0, keepdims=True)       # sum(targets)


def dice_loss(inputs: jax.Array, targets: jax.Array, smooth: float = 1.0) -> jax.Array:
    x = inputs.reshape(-1)
    t = targets.reshape(-1)
    if x.dtype == jnp.bool_:
        x = x.astype(jnp.float32)
    if t.dtype == jnp.bool_:
        t = t.astype(jnp.float32)
    n = x.shape[0]

    # Pad only to a multiple of 128 (zero padding does not change the sums).
    pad = (-n) % LANES
    if pad:
        x = jnp.pad(x, (0, pad))
        t = jnp.pad(t, (0, pad))
    rows = (n + pad) // LANES
    x2 = x.reshape(rows, LANES)
    t2 = t.reshape(rows, LANES)

    tm = min(TM_MAX, _round_up(rows, 8))
    total_blocks = -(-rows // tm)
    ncores = 2 if total_blocks >= 2 else 1          # shard across TCs on v7x
    steps_per_core = -(-total_blocks // ncores)
    needs_mask = (rows % tm != 0) or (ncores * steps_per_core != total_blocks)

    def in_map(c, i):
        # Clamp so overhang grid steps DMA an in-bounds (then masked) block.
        return (jnp.minimum(c * steps_per_core + i, total_blocks - 1), 0)

    kernel = functools.partial(
        _dice_partials_kernel, tm=tm, steps_per_core=steps_per_core,
        rows_valid=rows, needs_mask=needs_mask)

    parts = pl.pallas_call(
        kernel,
        out_shape=jax.ShapeDtypeStruct((ncores, 3, 1, LANES), jnp.float32),
        grid_spec=pltpu.PrefetchScalarGridSpec(
            num_scalar_prefetch=0,
            grid=(ncores, steps_per_core),
            in_specs=[
                pl.BlockSpec((tm, LANES), in_map),
                pl.BlockSpec((tm, LANES), in_map),
            ],
            out_specs=pl.BlockSpec((1, 3, 1, LANES), lambda c, i: (c, 0, 0, 0)),
        ),
        compiler_params=pltpu.CompilerParams(
            dimension_semantics=("parallel", "arbitrary"),
            vmem_limit_bytes=32 * 1024 * 1024,
        ),
    )(x2, t2)

    sums = jnp.sum(parts, axis=(0, 2, 3))  # (3,) tiny final reduce in wrapper
    intersection, sum_x, sum_t = sums[0], sums[1], sums[2]
    smooth = jnp.float32(smooth)
    dice = (2.0 * intersection + smooth) / (sum_x + sum_t + smooth)
    return 1.0 - dice


def dice_loss_ref(inputs, targets, smooth: float = 1.0):
    x = inputs.reshape(-1).astype(jnp.float32)
    t = targets.reshape(-1).astype(jnp.float32)
    intersection = jnp.sum(x * t)
    dice = (2.0 * intersection + smooth) / (jnp.sum(x) + jnp.sum(t) + smooth)
    return 1.0 - dice


def _check(shape, key, smooth=1.0):
    k1, k2 = jax.random.split(key)
    inputs = jax.nn.sigmoid(jax.random.normal(k1, shape, dtype=jnp.float32))
    targets = (jax.random.uniform(k2, shape) > 0.5).astype(jnp.float32)
    loss = jax.block_until_ready(dice_loss(inputs, targets, smooth=smooth))
    ref = jax.block_until_ready(dice_loss_ref(inputs, targets, smooth=smooth))
    assert jnp.allclose(loss, ref, atol=1e-5, rtol=1e-5), (shape, loss, ref)


if __name__ == "__main__":
    key = jax.random.PRNGKey(0)
    k0, k1, k2 = jax.random.split(key, 3)
    # Primary case (matches module usage): sigmoid probs vs binary masks.
    _check((2, 4, 16, 16), k0)
    # Unaligned size: exercises 128-pad + tail masking.
    _check((3, 5, 17, 13), k1)
    # Multi-block size: exercises the two-core split + partial last block.
    _check((2, 4, 300, 300), k2)
    print("KERNEL_OK")
</pallas_src>

<mosaic_0001>
module attributes {stable_mosaic.version = 11 : i64} {
  func.func @_dice_partials_kernel(%arg0: i32, %arg1: i32, %arg2: memref<16x128xf32, #tpu.memory_space<vmem>>, %arg3: memref<16x128xf32, #tpu.memory_space<vmem>>, %arg4: memref<1x3x1x128xf32, #tpu.memory_space<vmem>>) attributes {dimension_semantics = [#tpu.dimension_semantics<parallel>, #tpu.dimension_semantics<arbitrary>], iteration_bounds = array<i64: 1, 1>, scalar_prefetch = 0 : i64, scratch_operands = 0 : i64, tpu.core_type = #tpu.core_type<tc>, window_params = [{transform_indices = @transform_0, window_bounds = array<i64: 16, 128>}, {transform_indices = @transform_1, window_bounds = array<i64: 16, 128>}, {transform_indices = @transform_2, window_bounds = array<i64: 1, 3, 1, 128>}]} {
    %c0_i32 = arith.constant 0 : i32
    %0 = arith.cmpi eq, %arg1, %c0_i32 : i32
    %1 = arith.extui %0 : i1 to i32
    %c0_i32_0 = arith.constant 0 : i32
    %2 = arith.cmpi ne, %1, %c0_i32_0 : i32
    scf.if %2 {
      %cst_28 = arith.constant 0.000000e+00 : f32
      %30 = vector.broadcast %cst_28 : f32 to vector<1x3x1x128xf32>
      %c0_29 = arith.constant 0 : index
      %c0_30 = arith.constant 0 : index
      %c0_31 = arith.constant 0 : index
      %c0_32 = arith.constant 0 : index
      %31 = vector.load %arg4[%c0_29, %c0_30, %c0_31, %c0_32] : memref<1x3x1x128xf32, #tpu.memory_space<vmem>>, vector<1x3x1x128xf32>
      tpu.vector_store %arg4[%c0_29, %c0_30, %c0_31, %c0_32], %30 {strides = array<i32>} : memref<1x3x1x128xf32, #tpu.memory_space<vmem>>, vector<1x3x1x128xf32>,
    } else {
    }
    %c0 = arith.constant 0 : index
    %c0_1 = arith.constant 0 : index
    %3 = vector.load %arg2[%c0, %c0_1] : memref<16x128xf32, #tpu.memory_space<vmem>>, vector<16x128xf32>
    %c0_2 = arith.constant 0 : index
    %c0_3 = arith.constant 0 : index
    %4 = vector.load %arg3[%c0_2, %c0_3] : memref<16x128xf32, #tpu.memory_space<vmem>>, vector<16x128xf32>
    %c0_4 = arith.constant 0 : index
    %c0_5 = arith.constant 0 : index
    %c0_6 = arith.constant 0 : index
    %c0_7 = arith.constant 0 : index
    %5 = vector.load %arg4[%c0_4, %c0_5, %c0_6, %c0_7] : memref<1x3x1x128xf32, #tpu.memory_space<vmem>>, vector<1x1x1x128xf32>
    %6 = vector.shape_cast %5 : vector<1x1x1x128xf32> to vector<1x128xf32>
    %7 = arith.mulf %3, %4 : vector<16x128xf32>
    %cst = arith.constant dense<0.000000e+00> : vector<128xf32>
    %8 = vector.multi_reduction <add>, %7, %cst [0] : vector<16x128xf32> to vector<128xf32>
    %9 = vector.shape_cast %8 : vector<128xf32> to vector<1x128xf32>
    %10 = arith.addf %6, %9 : vector<1x128xf32>
    %c0_8 = arith.constant 0 : index
    %c0_9 = arith.constant 0 : index
    %c0_10 = arith.constant 0 : index
    %c0_11 = arith.constant 0 : index
    %11 = vector.load %arg4[%c0_8, %c0_9, %c0_10, %c0_11] : memref<1x3x1x128xf32, #tpu.memory_space<vmem>>, vector<1x1x1x128xf32>
    %12 = vector.shape_cast %11 : vector<1x1x1x128xf32> to vector<1x128xf32>
    %13 = vector.shape_cast %10 : vector<1x128xf32> to vector<1x1x1x128xf32>
    tpu.vector_store %arg4[%c0_8, %c0_9, %c0_10, %c0_11], %13 {strides = array<i32>} : memref<1x3x1x128xf32, #tpu.memory_space<vmem>>, vector<1x1x1x128xf32>,
    %c0_12 = arith.constant 0 : index
    %c1 = arith.constant 1 : index
    %c0_13 = arith.constant 0 : index
    %c0_14 = arith.constant 0 : index
    %14 = vector.load %arg4[%c0_12, %c1, %c0_13, %c0_14] : memref<1x3x1x128xf32, #tpu.memory_space<vmem>>, vector<1x1x1x128xf32>
    %15 = vector.shape_cast %14 : vector<1x1x1x128xf32> to vector<1x128xf32>
    %cst_15 = arith.constant dense<0.000000e+00> : vector<128xf32>
    %16 = vector.multi_reduction <add>, %3, %cst_15 [0] : vector<16x128xf32> to vector<128xf32>
    %17 = vector.shape_cast %16 : vector<128xf32> to vector<1x128xf32>
    %18 = arith.addf %15, %17 : vector<1x128xf32>
    %c0_16 = arith.constant 0 : index
    %c1_17 = arith.constant 1 : index
    %c0_18 = arith.constant 0 : index
    %c0_19 = arith.constant 0 : index
    %19 = vector.load %arg4[%c0_16, %c1_17, %c0_18, %c0_19] : memref<1x3x1x128xf32, #tpu.memory_space<vmem>>, vector<1x1x1x128xf32>
    %20 = vector.shape_cast %19 : vector<1x1x1x128xf32> to vector<1x128xf32>
    %21 = vector.shape_cast %18 : vector<1x128xf32> to vector<1x1x1x128xf32>
    tpu.vector_store %arg4[%c0_16, %c1_17, %c0_18, %c0_19], %21 {strides = array<i32>} : memref<1x3x1x128xf32, #tpu.memory_space<vmem>>, vector<1x1x1x128xf32>,
    %c0_20 = arith.constant 0 : index
    %c2 = arith.constant 2 : index
    %c0_21 = arith.constant 0 : index
    %c0_22 = arith.constant 0 : index
    %22 = vector.load %arg4[%c0_20, %c2, %c0_21, %c0_22] : memref<1x3x1x128xf32, #tpu.memory_space<vmem>>, vector<1x1x1x128xf32>
    %23 = vector.shape_cast %22 : vector<1x1x1x128xf32> to vector<1x128xf32>
    %cst_23 = arith.constant dense<0.000000e+00> : vector<128xf32>
    %24 = vector.multi_reduction <add>, %4, %cst_23 [0] : vector<16x128xf32> to vector<128xf32>
    %25 = vector.shape_cast %24 : vector<128xf32> to vector<1x128xf32>
    %26 = arith.addf %23, %25 : vector<1x128xf32>
    %c0_24 = arith.constant 0 : index
    %c2_25 = arith.constant 2 : index
    %c0_26 = arith.constant 0 : index
    %c0_27 = arith.constant 0 : index
    %27 = vector.load %arg4[%c0_24, %c2_25, %c0_26, %c0_27] : memref<1x3x1x128xf32, #tpu.memory_space<vmem>>, vector<1x1x1x128xf32>
    %28 = vector.shape_cast %27 : vector<1x1x1x128xf32> to vector<1x128xf32>
    %29 = vector.shape_cast %26 : vector<1x128xf32> to vector<1x1x1x128xf32>
    tpu.vector_store %arg4[%c0_24, %c2_25, %c0_26, %c0_27], %29 {strides = array<i32>} : memref<1x3x1x128xf32, #tpu.memory_space<vmem>>, vector<1x1x1x128xf32>,
    return
  }
  func.func @transform_0(%arg0: i32, %arg1: i32) -> (i32, i32) {
    %c1_i32 = arith.constant 1 : i32
    %0 = arith.muli %arg0, %c1_i32 : i32
    %1 = arith.addi %0, %arg1 : i32
    %c0_i32 = arith.constant 0 : i32
    %2 = arith.minsi %1, %c0_i32 : i32
    %c0_i32_0 = arith.constant 0 : i32
    %c0_i32_1 = arith.constant 0 : i32
    return %2, %c0_i32_0 : i32, i32
  }
  func.func @transform_1(%arg0: i32, %arg1: i32) -> (i32, i32) {
    %c1_i32 = arith.constant 1 : i32
    %0 = arith.muli %arg0, %c1_i32 : i32
    %1 = arith.addi %0, %arg1 : i32
    %c0_i32 = arith.constant 0 : i32
    %2 = arith.minsi %1, %c0_i32 : i32
    %c0_i32_0 = arith.constant 0 : i32
    %c0_i32_1 = arith.constant 0 : i32
    return %2, %c0_i32_0 : i32, i32
  }
  func.func @transform_2(%arg0: i32, %arg1: i32) -> (i32, i32, i32, i32) {
    %c0_i32 = arith.constant 0 : i32
    %c0_i32_0 = arith.constant 0 : i32
    %c0_i32_1 = arith.constant 0 : i32
    %c0_i32_2 = arith.constant 0 : i32
    return %arg0, %c0_i32, %c0_i32_0, %c0_i32_1 : i32, i32, i32, i32
  }
}

</mosaic_0001>

<bundles_post_ra>
// kernel: tpu_custom_call.1
= control target key start
LH: loop header
LB: loop body
LE: loop exit
PB: predicated region body
PF: predicated region fallthrough
CT: control target
= control target key end

     0   :  { %7 = vsyncpa [#allocation3], 0  ;;  %s266_s0 = inlined_call_operand.hbm [shape: f32[16,128], index: 0, kind: input, shape index: {}]   ;;  %s267_s1 = inlined_call_operand.hbm [shape: f32[16,128], index: 1, kind: input, shape index: {}]   ;;  %s268_s2 = inlined_call_operand.hbm [shape: f32[1,3,1,128], index: 2, kind: output, shape index: {}]  }
   0x1   :  { %8 = vsyncpa [#allocation6], 0 }
   0x2   :  { %9 = vsyncpa [#allocation4], 0  ;;  %s207_s9 = smov [#allocation2]   ;;  %s135_s13 = scalar_lea.hbm %s266_s0, 256 }
   0x3   :  { %s21_s10 = sshll.u32 %s207_s9, 4  ;;  %p136_p0 = scmp.ne.s32.totalorder %s266_s0, %s135_s13  ;;  %s22_s10 = int_to_ptr.vmem [resolvable:$true] %s21_s10 }
   0x4   :  { %p139_p1 = scmp.lt.u32.totalorder %s135_s13, %s266_s0 }
   0x6   :  { %p141_p2 = pnand %p139_p1, %p136_p0 }
   0x8   :  { %144 = shalt.err (!%p141_p2)
}
   0x9   :  { %s145_s18 = scalar_lea.vmem %s22_s10, 256  ;;  %p150_p4 = scmp.lt.s32.totalorder %s22_s10, %s22_s10 }
   0xa   :  { %p146_p3 = scmp.ne.s32.totalorder %s22_s10, %s145_s18  ;;  %p151_p5 = scmp.lt.s32.totalorder %s145_s18, %s145_s18 }
   0xc   :  { %p152_p6 = por %p151_p5, %p150_p4 }
   0xe   :  { %p153_p7 = pnand %p152_p6, %p146_p3 }
  0x10   :  { %156 = shalt.err (!%p153_p7)
}
  0x11   :  { %s208_s19 = smov 128   ;;  %s209_s20 = smov 8  }
  0x12   :  { %27 = dma.hbm_to_vmem [thread:$0]  %s266_s0, 256, %s22_s10, [#allocation3], %s208_s19, %s208_s19, %s209_s20  }
  0x13   :  { %s210_s23 = smov [#allocation5]   ;;  %s157_s27 = scalar_lea.hbm %s267_s1, 256 }
  0x14   :  { %s39_s24 = sshll.u32 %s210_s23, 4  ;;  %p158_p8 = scmp.ne.s32.totalorder %s267_s1, %s157_s27  ;;  %s40_s24 = int_to_ptr.vmem [resolvable:$true] %s39_s24 }
  0x15   :  { %p161_p9 = scmp.lt.u32.totalorder %s157_s27, %s267_s1 }
  0x17   :  { %p163_p10 = pnand %p161_p9, %p158_p8 }
  0x19   :  { %166 = shalt.err (!%p163_p10)
}
  0x1a   :  { %s167_s4 = scalar_lea.vmem %s40_s24, 256  ;;  %p172_p12 = scmp.lt.s32.totalorder %s40_s24, %s40_s24 }
  0x1b   :  { %p168_p11 = scmp.ne.s32.totalorder %s40_s24, %s167_s4  ;;  %p173_p13 = scmp.lt.s32.totalorder %s167_s4, %s167_s4 }
  0x1d   :  { %p174_p0 = por %p173_p13, %p172_p12 }
  0x1f   :  { %p175_p1 = pnand %p174_p0, %p168_p11 }
  0x21   :  { %178 = shalt.err (!%p175_p1)
}
  0x22   :  { %45 = dma.hbm_to_vmem [thread:$0]  %s267_s1, 256, %s40_s24, [#allocation6], %s208_s19, %s208_s19, %s209_s20  }
  0x23   :  { %201 = dma.done.wait [#allocation3], 256  }
  0x24   :  { %202 = vsyncadd [#allocation3], 4294967040 }
  0x25   :  { %203 = dma.done.wait [#allocation6], 256  }
  0x26   :  { %204 = vsyncadd [#allocation6], 4294967040  ;;  %v211_v0 = vmov 0.0   ;;  %v67_v1 = vld [vmem:[#allocation2] sm:$0xff]  ;;  %v68_v2 = vld [vmem:[#allocation2 + $0x8] sm:$0xff]  ;;  %s212_s1 = smov [#allocation7]  }
  0x27   :  { %64 = vst [vmem:[#allocation7] sm:$0x1] %v211_v0  ;;  %65 = vst [vmem:[#allocation7 + $0x1] sm:$0x1] %v211_v0  ;;  %v69_v3 = vld [vmem:[#allocation5] sm:$0xff]  ;;  %v70_v4 = vld [vmem:[#allocation5 + $0x8] sm:$0xff]  ;;  %v85_v6 = vadd.f32 %v68_v2, %v67_v1 }
  0x28   :  { %66 = vst [vmem:[#allocation7 + $0x2] sm:$0x1] %v211_v0  ;;  %v72_v5 = vmul.f32 %v69_v3, %v67_v1  ;;  %v73_v7 = vmul.f32 %v70_v4, %v68_v2  ;;  %v96_v8 = vadd.f32 %v70_v4, %v69_v3  ;;  %s110_s6 = sshll.u32 %s212_s1, 4  ;;  %s111_s6 = int_to_ptr.vmem [resolvable:$true] %s110_s6 }
  0x29   :  { %v86_v9 = vrot.slane %v85_v6, 4  ;;  %s179_s7 = scalar_lea.vmem %s111_s6, 48  ;;  %s183_s8 = scalar_lea.vmem %s111_s6, 64 }
  0x2a   :  { %v74_v10 = vadd.f32 %v73_v7, %v72_v5  ;;  %v97_v11 = vrot.slane %v96_v8, 4  ;;  %p180_p2 = scmp.ne.s32.totalorder %s111_s6, %s179_s7  ;;  %p184_p3 = scmp.lt.s32.totalorder %s111_s6, %s111_s6 }
  0x2b   :  { %v87_v12 = vadd.f32 %v86_v9, %v85_v6  ;;  %p185_p4 = scmp.lt.s32.totalorder %s183_s8, %s179_s7 }
  0x2c   :  { %v75_v13 = vrot.slane %v74_v10, 4  ;;  %v98_v14 = vadd.f32 %v97_v11, %v96_v8 }
  0x2d   :  { %v88_v15 = vrot.slane %v87_v12, 2  ;;  %p186_p5 = por %p185_p4, %p184_p3 }
  0x2e   :  { %v76_v16 = vadd.f32 %v75_v13, %v74_v10  ;;  %v99_v17 = vrot.slane %v98_v14, 2  ;;  %v84_v23 = vld [vmem:[#allocation7 + $0x1] sm:$0x1]  ;;  %v71_v29 = vld [vmem:[#allocation7] sm:$0x1] }
  0x2f   :  { %v89_v18 = vadd.f32 %v88_v15, %v87_v12  ;;  %v95_v26 = vld [vmem:[#allocation7 + $0x2] sm:$0x1]  ;;  %p187_p6 = pnand %p186_p5, %p180_p2 }
  0x30   :  { %v77_v19 = vrot.slane %v76_v16, 2  ;;  %v100_v20 = vadd.f32 %v99_v17, %v98_v14 }
  0x31   :  { %v90_v21 = vrot.slane %v89_v18, 1 }
  0x32   :  { %v78_v22 = vadd.f32 %v77_v19, %v76_v16  ;;  %v101_v24 = vrot.slane %v100_v20, 1 }
  0x33   :  { %v91_v25 = vadd.f32 %v90_v21, %v89_v18 }
  0x34   :  { %v79_v27 = vrot.slane %v78_v22, 1  ;;  %v102_v28 = vadd.f32 %v101_v24, %v100_v20 }
  0x35   :  { %v92_v30 = vadd.f32 %v91_v25, %v84_v23 }
  0x36   :  { %v80_v31 = vadd.f32 %v79_v27, %v78_v22  ;;  %v103_v32 = vadd.f32 %v102_v28, %v95_v26 }
  0x37   :  { %93 = vst [vmem:[#allocation7 + $0x1] sm:$0x1] %v92_v30 }
  0x38   :  { %v81_v33 = vadd.f32 %v80_v31, %v71_v29  ;;  %104 = vst [vmem:[#allocation7 + $0x2] sm:$0x1] %v103_v32 }
  0x3a   :  { %82 = vst [vmem:[#allocation7] sm:$0x1] %v81_v33 }
  0x3b   :  { %190 = shalt.err (!%p187_p6)
}
  0x3c   :  { %s191_s11 = scalar_lea.hbm %s268_s2, 48 }
  0x3d   :  { %p192_p7 = scmp.ne.s32.totalorder %s268_s2, %s191_s11  ;;  %p195_p8 = scmp.lt.u32.totalorder %s191_s11, %s268_s2 }
  0x3f   :  { %p197_p9 = pnand %p195_p8, %p192_p7 }
  0x41   :  { %200 = shalt.err (!%p197_p9)
}
  0x42   :  { %s213_s16 = smov 16   ;;  %s214_s17 = smov 1  }
  0x43   :  { %116 = dma.vmem_to_hbm [thread:$0]  %s111_s6, 48, %s268_s2, [#allocation4], %s213_s16, %s213_s16, %s214_s17  }
  0x44   :  { %205 = dma.done.wait [#allocation4], 48  }
  0x45   :  { %206 = vsyncadd [#allocation4], 4294967248 }
  0x46   :  { %120 = vsyncpa [#allocation3], 1 }
  0x47   :  { %121 = vsyncpa [#allocation6], 1 }
  0x48   :  { %122 = vsyncpa [#allocation4], 1 }

</bundles_post_ra>
